<compile_context>
chip_gen: v7x
topology: tpu7x:2x2x1
jax: 0.10.0
libtpu: 0.0.40
codegen_flags: <defaults>
</compile_context>

<pallas_src>
import itertools

import jax
import jax.numpy as jnp
import numpy as np
from jax.experimental import pallas as pl
from jax.experimental.pallas import tpu as pltpu


# ---------------------------------------------------------------------------
# Constant iDCT basis (matches DiffJPEG idct_8x8 parameters).
# ---------------------------------------------------------------------------
def _idct_constants():
    alpha = np.array([1.0 / np.sqrt(2)] + [1.0] * 7, dtype=np.float64)
    alpha2d = np.outer(alpha, alpha)                            # (8, 8)
    basis = np.zeros((8, 8, 8, 8), dtype=np.float64)
    for x, y, u, v in itertools.product(range(8), repeat=4):
        basis[x, y, u, v] = (np.cos((2 * u + 1) * x * np.pi / 16)
                             * np.cos((2 * v + 1) * y * np.pi / 16))
    return alpha2d, basis


_ALPHA_2D, _IDCT_BASIS = _idct_constants()
# (64, 64): row = flattened input coeff index (x*8+y), col = output pixel (u*8+v).
_IDCT_MAT_F32 = jnp.asarray(_IDCT_BASIS.reshape(64, 64), dtype=jnp.float32)
_ALPHA_FLAT_F32 = jnp.asarray(_ALPHA_2D.reshape(64), dtype=jnp.float32)


def _round_up(x, m):
    return ((x + m - 1) // m) * m


# ---------------------------------------------------------------------------
# Kernel 1: fused dequantize + 8x8 inverse DCT (one MXU matmul per tile).
# ---------------------------------------------------------------------------
def _dequant_idct_kernel(x_ref, w_ref, o_ref):
    # x_ref: (tile_rows, L) packed DCT coefficients (L = 64 * pack)
    # w_ref: (L, L) block-diagonal fused dequant+iDCT matrix
    acc = jnp.dot(x_ref[...], w_ref[...], preferred_element_type=jnp.float32)
    o_ref[...] = (acc + 128.0).astype(o_ref.dtype)


def _fused_dequant_idct(blocks, qt, *, tile_rows=2048):
    """blocks: (B, N, 8, 8) quantized DCT coeffs; qt: (8, 8). Returns spatial (B, N, 8, 8) f32."""
    b, n, h, w = blocks.shape
    assert (h, w) == (8, 8) and qt.shape == (8, 8)
    rows = b * n

    # Fused per-block transform matrix (computed in f32 regardless of input dtype).
    qt_alpha = qt.astype(jnp.float32).reshape(64) * _ALPHA_FLAT_F32
    w64 = 0.25 * qt_alpha[:, None] * _IDCT_MAT_F32               # (64, 64)

    # Pack 2 blocks per row -> 128 lanes (one full vreg, unmasked stores).
    pack = 2 if rows % 2 == 0 else 1
    lane = 64 * pack
    wmat = jnp.kron(jnp.eye(pack, dtype=jnp.float32), w64) if pack > 1 else w64

    rows_p = rows // pack
    x2d = blocks.astype(jnp.float32).reshape(rows_p, lane)

    # ~1 MiB row tiles; keep >= 2 grid steps when there is enough work so the
    # "parallel" axis can be split across v7x's two TensorCores.
    tile = tile_rows
    if rows_p >= 16:
        tile = min(tile, _round_up(pl.cdiv(rows_p, 2), 8))
    tile = min(tile, rows_p)
    grid = (pl.cdiv(rows_p, tile),)

    out2d = pl.pallas_call(
        _dequant_idct_kernel,
        out_shape=jax.ShapeDtypeStruct((rows_p, lane), jnp.float32),
        grid_spec=pltpu.PrefetchScalarGridSpec(
            num_scalar_prefetch=0,
            grid=grid,
            in_specs=[
                pl.BlockSpec((tile, lane), lambda i: (i, 0)),
                pl.BlockSpec((lane, lane), lambda i: (0, 0)),   # W stays resident
            ],
            out_specs=pl.BlockSpec((tile, lane), lambda i: (i, 0)),
        ),
        compiler_params=pltpu.CompilerParams(
            dimension_semantics=("parallel",)),
    )(x2d, wmat)

    return out2d.reshape(b, n, 8, 8)


# ---------------------------------------------------------------------------
# Kernel 2: YCbCr -> RGB + clamp, writing (B, 3, H, W) directly.
# ---------------------------------------------------------------------------
def _ycbcr_to_rgb_kernel(y_ref, cb_ref, cr_ref, o_ref):
    # y/cb/cr refs: (tile_h, W); o_ref: (3, tile_h, W)
    y = y_ref[...]
    cb = cb_ref[...] - 128.0
    cr = cr_ref[...] - 128.0
    o_ref[0] = jnp.clip(y + 1.402 * cr, 0.0, 255.0)
    o_ref[1] = jnp.clip(y - 0.344136 * cb - 0.714136 * cr, 0.0, 255.0)
    o_ref[2] = jnp.clip(y + 1.772 * cb, 0.0, 255.0)


def _ycbcr_to_rgb_clamp(yp, cbp, crp, *, target_tile_bytes=512 * 1024):
    b, h, w = yp.shape
    # ~512 KiB per input-plane tile (x3 inputs, x3 output channels, double
    # buffered -> ~6 MiB VMEM, safe on all generations). tile_h multiple of 8.
    tile_h = max(8, (target_tile_bytes // (w * 4)) // 8 * 8)
    tile_h = min(tile_h, h)
    grid = (b, pl.cdiv(h, tile_h))

    plane_spec = pl.BlockSpec((None, tile_h, w), lambda bi, i: (bi, i, 0))
    return pl.pallas_call(
        _ycbcr_to_rgb_kernel,
        out_shape=jax.ShapeDtypeStruct((b, 3, h, w), jnp.float32),
        grid_spec=pltpu.PrefetchScalarGridSpec(
            num_scalar_prefetch=0,
            grid=grid,
            in_specs=[plane_spec, plane_spec, plane_spec],
            out_specs=pl.BlockSpec((None, 3, tile_h, w),
                                   lambda bi, i: (bi, 0, i, 0)),
        ),
        compiler_params=pltpu.CompilerParams(
            dimension_semantics=("parallel", "parallel")),
    )(yp.astype(jnp.float32), cbp.astype(jnp.float32), crp.astype(jnp.float32))


# ---------------------------------------------------------------------------
# Layout-only stages (left to XLA).
# ---------------------------------------------------------------------------
def _block_merge(blocks, height, width):
    # block_merging: (B, (h/8)*(w/8), 8, 8) -> (B, h, w)
    b = blocks.shape[0]
    x = blocks.reshape(b, height // 8, width // 8, 8, 8)
    x = jnp.transpose(x, (0, 1, 3, 2, 4))
    return x.reshape(b, height, width)


def _chroma_upsample2x(x):
    # chroma_upsampling.repeat: nearest-neighbour 2x in both spatial dims.
    return jnp.repeat(jnp.repeat(x, 2, axis=1), 2, axis=2)


# ---------------------------------------------------------------------------
# Full decompress_jpeg forward.
# ---------------------------------------------------------------------------
def decompress_jpeg(y, cb, cr, y_qt, c_qt, height, width):
    """y: (B, H/8*W/8, 8, 8); cb, cr: (B, H/16*W/16, 8, 8); y_qt/c_qt: (8, 8).
    Returns (B, 3, H, W) float32 RGB in [0, 255]."""
    y_sp = _fused_dequant_idct(y, y_qt)
    cb_sp = _fused_dequant_idct(cb, c_qt)
    cr_sp = _fused_dequant_idct(cr, c_qt)

    y_img = _block_merge(y_sp, height, width)
    cb_img = _block_merge(cb_sp, height // 2, width // 2)
    cr_img = _block_merge(cr_sp, height // 2, width // 2)

    cb_up = _chroma_upsample2x(cb_img)
    cr_up = _chroma_upsample2x(cr_img)
    return _ycbcr_to_rgb_clamp(y_img, cb_up, cr_up)


# ---------------------------------------------------------------------------
# Pure NumPy (float64) reference that mirrors the PyTorch module exactly.
# ---------------------------------------------------------------------------
def _reference_numpy(y, cb, cr, y_qt, c_qt, height, width):
    def component(coef, qt, h, w):
        x = np.asarray(coef, np.float64) * np.asarray(qt, np.float64)      # dequantize
        x = x * _ALPHA_2D
        x = 0.25 * np.tensordot(x, _IDCT_BASIS, axes=2) + 128.0            # idct_8x8
        b = x.shape[0]
        x = x.reshape(b, h // 8, w // 8, 8, 8).transpose(0, 1, 3, 2, 4)    # block_merging
        return x.reshape(b, h, w)

    yp = component(y, y_qt, height, width)
    cbp = component(cb, c_qt, height // 2, width // 2)
    crp = component(cr, c_qt, height // 2, width // 2)
    up = lambda p: np.repeat(np.repeat(p, 2, axis=1), 2, axis=2)           # chroma_upsampling
    img = np.stack([yp, up(cbp), up(crp)], axis=-1)
    shift = np.array([0.0, -128.0, -128.0])
    matrix = np.array([[1.0, 0.0, 1.402],
                       [1.0, -0.344136, -0.714136],
                       [1.0, 1.772, 0.0]], dtype=np.float64).T
    rgb = np.tensordot(img + shift, matrix, axes=1).transpose(0, 3, 1, 2)  # ycbcr_to_rgb_jpeg
    return np.clip(rgb, 0.0, 255.0)


if __name__ == "__main__":
    key = jax.random.PRNGKey(0)
    B, H, W = 2, 64, 64
    factor = 0.25

    # Standard JPEG luma/chroma tables (DiffJPEG utils), scaled by the factor.
    y_table = np.array(
        [[16, 11, 10, 16, 24, 40, 51, 61],
         [12, 12, 14, 19, 26, 58, 60, 55],
         [14, 13, 16, 24, 40, 57, 69, 56],
         [14, 17, 22, 29, 51, 87, 80, 62],
         [18, 22, 37, 56, 68, 109, 103, 77],
         [24, 35, 55, 64, 81, 104, 113, 92],
         [49, 64, 78, 87, 103, 121, 120, 101],
         [72, 92, 95, 98, 112, 100, 103, 99]], dtype=np.float32).T
    c_table = np.full((8, 8), 99.0, dtype=np.float32)
    c_table[:4, :4] = np.array([[17, 18, 24, 47], [18, 21, 26, 66],
                                [24, 26, 56, 99], [47, 66, 99, 99]], dtype=np.float32).T
    y_qt = jnp.asarray(y_table * factor)
    c_qt = jnp.asarray(c_table * factor)

    n_y = (H // 8) * (W // 8)
    n_c = (H // 16) * (W // 16)
    ky, kcb, kcr = jax.random.split(key, 3)
    # Small integer-ish coefficients, typical of post-quantization JPEG data.
    y_coef = jnp.round(jax.random.normal(ky, (B, n_y, 8, 8), dtype=jnp.float32) * 1.5)
    cb_coef = jnp.round(jax.random.normal(kcb, (B, n_c, 8, 8), dtype=jnp.float32) * 1.5)
    cr_coef = jnp.round(jax.random.normal(kcr, (B, n_c, 8, 8), dtype=jnp.float32) * 1.5)

    fn = jax.jit(decompress_jpeg, static_argnums=(5, 6))
    out = jax.block_until_ready(fn(y_coef, cb_coef, cr_coef, y_qt, c_qt, H, W))

    ref = _reference_numpy(y_coef, cb_coef, cr_coef, y_qt, c_qt, H, W)
    assert out.shape == (B, 3, H, W) and out.dtype == jnp.float32
    # Tolerance (in 0..255 pixel units) leaves headroom for MXU f32 pass behaviour
    # vs. the float64 reference; structural bugs produce errors orders larger.
    np.testing.assert_allclose(np.asarray(out), ref, rtol=0.0, atol=2.0)
    print("KERNEL_OK")
</pallas_src>

<mosaic_0001>
module attributes {stable_mosaic.version = 11 : i64} {
  func.func @_dequant_idct_kernel(%arg0: i32, %arg1: memref<8x128xf32, #tpu.memory_space<vmem>>, %arg2: memref<128x128xf32, #tpu.memory_space<vmem>>, %arg3: memref<8x128xf32, #tpu.memory_space<vmem>>) attributes {dimension_semantics = [#tpu.dimension_semantics<parallel>], iteration_bounds = array<i64: 2>, scalar_prefetch = 0 : i64, scratch_operands = 0 : i64, tpu.core_type = #tpu.core_type<tc>, window_params = [{transform_indices = @transform_0, window_bounds = array<i64: 8, 128>}, {pipeline_mode = #tpu.pipeline_mode<synchronous>, transform_indices = @transform_1, window_bounds = array<i64: 128, 128>}, {transform_indices = @transform_2, window_bounds = array<i64: 8, 128>}]} {
    %c0 = arith.constant 0 : index
    %c0_0 = arith.constant 0 : index
    %0 = vector.load %arg1[%c0, %c0_0] : memref<8x128xf32, #tpu.memory_space<vmem>>, vector<8x128xf32>
    %c0_1 = arith.constant 0 : index
    %c0_2 = arith.constant 0 : index
    %1 = vector.load %arg2[%c0_1, %c0_2] : memref<128x128xf32, #tpu.memory_space<vmem>>, vector<128x128xf32>
    %cst = arith.constant dense<0.000000e+00> : vector<8x128xf32>
    %2 = tpu.matmul %0, %1, %cst {dimension_numbers = #tpu.dot_dimension_numbers<[1], [0], [0], [1], [0, 0, 1, 1], [], []>} : vector<8x128xf32>, vector<128x128xf32>, vector<8x128xf32> -> vector<8x128xf32>
    %cst_3 = arith.constant 1.280000e+02 : f32
    %3 = vector.broadcast %cst_3 : f32 to vector<8x128xf32>
    %4 = arith.addf %2, %3 : vector<8x128xf32>
    %c0_4 = arith.constant 0 : index
    %c0_5 = arith.constant 0 : index
    %5 = vector.load %arg3[%c0_4, %c0_5] : memref<8x128xf32, #tpu.memory_space<vmem>>, vector<8x128xf32>
    tpu.vector_store %arg3[%c0_4, %c0_5], %4 {strides = array<i32>} : memref<8x128xf32, #tpu.memory_space<vmem>>, vector<8x128xf32>,
    return
  }
  func.func @transform_0(%arg0: i32) -> (i32, i32) {
    %c0_i32 = arith.constant 0 : i32
    %c0_i32_0 = arith.constant 0 : i32
    return %arg0, %c0_i32 : i32, i32
  }
  func.func @transform_1(%arg0: i32) -> (i32, i32) {
    %c0_i32 = arith.constant 0 : i32
    %c0_i32_0 = arith.constant 0 : i32
    %c0_i32_1 = arith.constant 0 : i32
    return %c0_i32, %c0_i32_0 : i32, i32
  }
  func.func @transform_2(%arg0: i32) -> (i32, i32) {
    %c0_i32 = arith.constant 0 : i32
    %c0_i32_0 = arith.constant 0 : i32
    return %arg0, %c0_i32 : i32, i32
  }
}

module attributes {stable_mosaic.version = 11 : i64} {
  func.func @_dequant_idct_kernel(%arg0: i32, %arg1: memref<32x128xf32, #tpu.memory_space<vmem>>, %arg2: memref<128x128xf32, #tpu.memory_space<vmem>>, %arg3: memref<32x128xf32, #tpu.memory_space<vmem>>) attributes {dimension_semantics = [#tpu.dimension_semantics<parallel>], iteration_bounds = array<i64: 2>, scalar_prefetch = 0 : i64, scratch_operands = 0 : i64, tpu.core_type = #tpu.core_type<tc>, window_params = [{transform_indices = @transform_0, window_bounds = array<i64: 32, 128>}, {pipeline_mode = #tpu.pipeline_mode<synchronous>, transform_indices = @transform_1, window_bounds = array<i64: 128, 128>}, {transform_indices = @transform_2, window_bounds = array<i64: 32, 128>}]} {
    %c0 = arith.constant 0 : index
    %c0_0 = arith.constant 0 : index
    %0 = vector.load %arg1[%c0, %c0_0] : memref<32x128xf32, #tpu.memory_space<vmem>>, vector<32x128xf32>
    %c0_1 = arith.constant 0 : index
    %c0_2 = arith.constant 0 : index
    %1 = vector.load %arg2[%c0_1, %c0_2] : memref<128x128xf32, #tpu.memory_space<vmem>>, vector<128x128xf32>
    %cst = arith.constant dense<0.000000e+00> : vector<32x128xf32>
    %2 = tpu.matmul %0, %1, %cst {dimension_numbers = #tpu.dot_dimension_numbers<[1], [0], [0], [1], [0, 0, 1, 1], [], []>} : vector<32x128xf32>, vector<128x128xf32>, vector<32x128xf32> -> vector<32x128xf32>
    %cst_3 = arith.constant 1.280000e+02 : f32
    %3 = vector.broadcast %cst_3 : f32 to vector<32x128xf32>
    %4 = arith.addf %2, %3 : vector<32x128xf32>
    %c0_4 = arith.constant 0 : index
    %c0_5 = arith.constant 0 : index
    %5 = vector.load %arg3[%c0_4, %c0_5] : memref<32x128xf32, #tpu.memory_space<vmem>>, vector<32x128xf32>
    tpu.vector_store %arg3[%c0_4, %c0_5], %4 {strides = array<i32>} : memref<32x128xf32, #tpu.memory_space<vmem>>, vector<32x128xf32>,
    return
  }
  func.func @transform_0(%arg0: i32) -> (i32, i32) {
    %c0_i32 = arith.constant 0 : i32
    %c0_i32_0 = arith.constant 0 : i32
    return %arg0, %c0_i32 : i32, i32
  }
  func.func @transform_1(%arg0: i32) -> (i32, i32) {
    %c0_i32 = arith.constant 0 : i32
    %c0_i32_0 = arith.constant 0 : i32
    %c0_i32_1 = arith.constant 0 : i32
    return %c0_i32, %c0_i32_0 : i32, i32
  }
  func.func @transform_2(%arg0: i32) -> (i32, i32) {
    %c0_i32 = arith.constant 0 : i32
    %c0_i32_0 = arith.constant 0 : i32
    return %arg0, %c0_i32 : i32, i32
  }
}

module attributes {stable_mosaic.version = 11 : i64} {
  func.func @_ycbcr_to_rgb_kernel(%arg0: i32, %arg1: i32, %arg2: memref<1x64x64xf32, #tpu.memory_space<vmem>>, %arg3: memref<1x64x64xf32, #tpu.memory_space<vmem>>, %arg4: memref<1x64x64xf32, #tpu.memory_space<vmem>>, %arg5: memref<1x3x64x64xf32, #tpu.memory_space<vmem>>) attributes {dimension_semantics = [#tpu.dimension_semantics<parallel>, #tpu.dimension_semantics<parallel>], iteration_bounds = array<i64: 2, 1>, scalar_prefetch = 0 : i64, scratch_operands = 0 : i64, tpu.core_type = #tpu.core_type<tc>, window_params = [{transform_indices = @transform_0, window_bounds = array<i64: 1, 64, 64>}, {transform_indices = @transform_1, window_bounds = array<i64: 1, 64, 64>}, {transform_indices = @transform_2, window_bounds = array<i64: 1, 64, 64>}, {transform_indices = @transform_3, window_bounds = array<i64: 1, 3, 64, 64>}]} {
    %c0 = arith.constant 0 : index
    %c0_0 = arith.constant 0 : index
    %c0_1 = arith.constant 0 : index
    %0 = vector.load %arg2[%c0, %c0_0, %c0_1] : memref<1x64x64xf32, #tpu.memory_space<vmem>>, vector<1x64x64xf32>
    %1 = vector.shape_cast %0 : vector<1x64x64xf32> to vector<64x64xf32>
    %c0_2 = arith.constant 0 : index
    %c0_3 = arith.constant 0 : index
    %c0_4 = arith.constant 0 : index
    %2 = vector.load %arg3[%c0_2, %c0_3, %c0_4] : memref<1x64x64xf32, #tpu.memory_space<vmem>>, vector<1x64x64xf32>
    %3 = vector.shape_cast %2 : vector<1x64x64xf32> to vector<64x64xf32>
    %cst = arith.constant 1.280000e+02 : f32
    %4 = vector.broadcast %cst : f32 to vector<64x64xf32>
    %5 = arith.subf %3, %4 : vector<64x64xf32>
    %c0_5 = arith.constant 0 : index
    %c0_6 = arith.constant 0 : index
    %c0_7 = arith.constant 0 : index
    %6 = vector.load %arg4[%c0_5, %c0_6, %c0_7] : memref<1x64x64xf32, #tpu.memory_space<vmem>>, vector<1x64x64xf32>
    %7 = vector.shape_cast %6 : vector<1x64x64xf32> to vector<64x64xf32>
    %cst_8 = arith.constant 1.280000e+02 : f32
    %8 = vector.broadcast %cst_8 : f32 to vector<64x64xf32>
    %9 = arith.subf %7, %8 : vector<64x64xf32>
    %cst_9 = arith.constant 1.402000e+00 : f32
    %10 = vector.broadcast %cst_9 : f32 to vector<64x64xf32>
    %11 = arith.mulf %10, %9 : vector<64x64xf32>
    %12 = arith.addf %1, %11 : vector<64x64xf32>
    %cst_10 = arith.constant 0.000000e+00 : f32
    %cst_11 = arith.constant 2.550000e+02 : f32
    %13 = vector.broadcast %cst_10 : f32 to vector<64x64xf32>
    %14 = arith.maximumf %13, %12 : vector<64x64xf32>
    %15 = vector.broadcast %cst_11 : f32 to vector<64x64xf32>
    %16 = arith.minimumf %15, %14 : vector<64x64xf32>
    %c0_12 = arith.constant 0 : index
    %c0_13 = arith.constant 0 : index
    %c0_14 = arith.constant 0 : index
    %c0_15 = arith.constant 0 : index
    %17 = vector.load %arg5[%c0_12, %c0_13, %c0_14, %c0_15] : memref<1x3x64x64xf32, #tpu.memory_space<vmem>>, vector<1x1x64x64xf32>
    %18 = vector.shape_cast %17 : vector<1x1x64x64xf32> to vector<64x64xf32>
    %19 = vector.shape_cast %16 : vector<64x64xf32> to vector<1x1x64x64xf32>
    tpu.vector_store %arg5[%c0_12, %c0_13, %c0_14, %c0_15], %19 {strides = array<i32>} : memref<1x3x64x64xf32, #tpu.memory_space<vmem>>, vector<1x1x64x64xf32>,
    %cst_16 = arith.constant 3.441360e-01 : f32
    %20 = vector.broadcast %cst_16 : f32 to vector<64x64xf32>
    %21 = arith.mulf %20, %5 : vector<64x64xf32>
    %22 = arith.subf %1, %21 : vector<64x64xf32>
    %cst_17 = arith.constant 7.141360e-01 : f32
    %23 = vector.broadcast %cst_17 : f32 to vector<64x64xf32>
    %24 = arith.mulf %23, %9 : vector<64x64xf32>
    %25 = arith.subf %22, %24 : vector<64x64xf32>
    %cst_18 = arith.constant 0.000000e+00 : f32
    %cst_19 = arith.constant 2.550000e+02 : f32
    %26 = vector.broadcast %cst_18 : f32 to vector<64x64xf32>
    %27 = arith.maximumf %26, %25 : vector<64x64xf32>
    %28 = vector.broadcast %cst_19 : f32 to vector<64x64xf32>
    %29 = arith.minimumf %28, %27 : vector<64x64xf32>
    %c0_20 = arith.constant 0 : index
    %c1 = arith.constant 1 : index
    %c0_21 = arith.constant 0 : index
    %c0_22 = arith.constant 0 : index
    %30 = vector.load %arg5[%c0_20, %c1, %c0_21, %c0_22] : memref<1x3x64x64xf32, #tpu.memory_space<vmem>>, vector<1x1x64x64xf32>
    %31 = vector.shape_cast %30 : vector<1x1x64x64xf32> to vector<64x64xf32>
    %32 = vector.shape_cast %29 : vector<64x64xf32> to vector<1x1x64x64xf32>
    tpu.vector_store %arg5[%c0_20, %c1, %c0_21, %c0_22], %32 {strides = array<i32>} : memref<1x3x64x64xf32, #tpu.memory_space<vmem>>, vector<1x1x64x64xf32>,
    %cst_23 = arith.constant 1.772000e+00 : f32
    %33 = vector.broadcast %cst_23 : f32 to vector<64x64xf32>
    %34 = arith.mulf %33, %5 : vector<64x64xf32>
    %35 = arith.addf %1, %34 : vector<64x64xf32>
    %cst_24 = arith.constant 0.000000e+00 : f32
    %cst_25 = arith.constant 2.550000e+02 : f32
    %36 = vector.broadcast %cst_24 : f32 to vector<64x64xf32>
    %37 = arith.maximumf %36, %35 : vector<64x64xf32>
    %38 = vector.broadcast %cst_25 : f32 to vector<64x64xf32>
    %39 = arith.minimumf %38, %37 : vector<64x64xf32>
    %c0_26 = arith.constant 0 : index
    %c2 = arith.constant 2 : index
    %c0_27 = arith.constant 0 : index
    %c0_28 = arith.constant 0 : index
    %40 = vector.load %arg5[%c0_26, %c2, %c0_27, %c0_28] : memref<1x3x64x64xf32, #tpu.memory_space<vmem>>, vector<1x1x64x64xf32>
    %41 = vector.shape_cast %40 : vector<1x1x64x64xf32> to vector<64x64xf32>
    %42 = vector.shape_cast %39 : vector<64x64xf32> to vector<1x1x64x64xf32>
    tpu.vector_store %arg5[%c0_26, %c2, %c0_27, %c0_28], %42 {strides = array<i32>} : memref<1x3x64x64xf32, #tpu.memory_space<vmem>>, vector<1x1x64x64xf32>,
    return
  }
  func.func @transform_0(%arg0: i32, %arg1: i32) -> (i32, i32, i32) {
    %c0_i32 = arith.constant 0 : i32
    %c0_i32_0 = arith.constant 0 : i32
    return %arg0, %arg1, %c0_i32 : i32, i32, i32
  }
  func.func @transform_1(%arg0: i32, %arg1: i32) -> (i32, i32, i32) {
    %c0_i32 = arith.constant 0 : i32
    %c0_i32_0 = arith.constant 0 : i32
    return %arg0, %arg1, %c0_i32 : i32, i32, i32
  }
  func.func @transform_2(%arg0: i32, %arg1: i32) -> (i32, i32, i32) {
    %c0_i32 = arith.constant 0 : i32
    %c0_i32_0 = arith.constant 0 : i32
    return %arg0, %arg1, %c0_i32 : i32, i32, i32
  }
  func.func @transform_3(%arg0: i32, %arg1: i32) -> (i32, i32, i32, i32) {
    %c0_i32 = arith.constant 0 : i32
    %c0_i32_0 = arith.constant 0 : i32
    %c0_i32_1 = arith.constant 0 : i32
    return %arg0, %c0_i32, %arg1, %c0_i32_0 : i32, i32, i32, i32
  }
}

</mosaic_0001>

<bundles_post_ra>
// kernel: decompress_jpeg.6
= control target key start
LH: loop header
LB: loop body
LE: loop exit
PB: predicated region body
PF: predicated region fallthrough
CT: control target
= control target key end

     0   :  { %s402_s9 = smov 0   ;;  %s471_s0 = inlined_call_operand.vmem [shape: f32[16,128], index: 0, kind: input, shape index: {}]   ;;  %s472_s1 = inlined_call_operand.vmem [shape: f32[128,128], index: 1, kind: input, shape index: {}]   ;;  %s473_s2 = inlined_call_operand.vmem [shape: f32[16,128], index: 2, kind: output, shape index: {}]  }
   0x1 LB: > { %s280_s10 = sadd.s32 4294967295, %s382_s9   ;;  %p284_p0 = scmp.ge.s32.totalorder %s382_s9, 1  ;;  %s382_s9 = sphi %s402_s9, %s12_s9  }
   0x2   : > { %p111_p1 = scmp.lt.s32.totalorder %s382_s9, 3 }
   0x4   : > { %p112_p2 = pnand %p284_p0, %p111_p1 }
   0x5   : > { %v140_v0 = vld [vmem:[%s472_s1] sm:$0xff] (!%p112_p2)  ;;  %v141_v1 = vld [vmem:[%s472_s1 + $0x8] sm:$0xff] (!%p112_p2)  ;;  %v142_v2 = vld [vmem:[%s472_s1 + $0x10] sm:$0xff] (!%p112_p2)  ;;  %v384_v3 = vmov (!%p112_p2), 0.0|0.0   ;;  %vm385_vm0 = vmmov (!%p112_p2), 0   ;;  %v386_v6 = vmov (!%p112_p2), 0.0  }
   0x6   : > { %115 = sbr.rel (%p112_p2) target bundleno = 254 (0xfe), region = 28  ;;  %341 = vmatprep.subr.bf16.mxu0 (!%p112_p2), %v384_v3  ;;  %v342_v4 = vpack.c.bf16 (!%p112_p2), %v141_v1, %v140_v0  ;;  %v143_v5 = vld [vmem:[%s472_s1 + $0x18] sm:$0xff] (!%p112_p2)  ;;  %338 = vmatprep.mubr.msk.f32.mxu0 (!%p112_p2), %vm385_vm0, %v386_v6  ;;  %v144_v8 = vld [vmem:[%s472_s1 + $0x20] sm:$0xff] (!%p112_p2)  ;;  %v145_v9 = vld [vmem:[%s472_s1 + $0x28] sm:$0xff] (!%p112_p2)  ;;  %p131_p3 = scmp.lt.s32.totalorder (!%p112_p2), %s280_s10, 1 }
   0x7   : > { %v345_v7 = vpack.c.bf16 (!%p112_p2), %v143_v5, %v142_v2  ;;  %v348_v10 = vpack.c.bf16 (!%p112_p2), %v145_v9, %v144_v8  ;;  %v146_v11 = vld [vmem:[%s472_s1 + $0x30] sm:$0xff] (!%p112_p2)  ;;  %v147_v12 = vld [vmem:[%s472_s1 + $0x38] sm:$0xff] (!%p112_p2)  ;;  %v148_v14 = vld [vmem:[%s472_s1 + $0x40] sm:$0xff] (!%p112_p2) }
   0x8   : > { %343 = vmatpush3.bf16.msra.mxu0 (!%p112_p2), %v342_v4  ;;  %v351_v13 = vpack.c.bf16 (!%p112_p2), %v147_v12, %v146_v11  ;;  %v149_v15 = vld [vmem:[%s472_s1 + $0x48] sm:$0xff] (!%p112_p2)  ;;  %v150_v17 = vld [vmem:[%s472_s1 + $0x50] sm:$0xff] (!%p112_p2)  ;;  %v151_v18 = vld [vmem:[%s472_s1 + $0x58] sm:$0xff] (!%p112_p2) }
   0x9   : > { %344 = vmatprep.subr.bf16.mxu0 (!%p112_p2), %v384_v3  ;;  %v354_v16 = vpack.c.bf16 (!%p112_p2), %v149_v15, %v148_v14  ;;  %v357_v19 = vpack.c.bf16 (!%p112_p2), %v151_v18, %v150_v17  ;;  %v152_v20 = vld [vmem:[%s472_s1 + $0x60] sm:$0xff] (!%p112_p2)  ;;  %v153_v21 = vld [vmem:[%s472_s1 + $0x68] sm:$0xff] (!%p112_p2)  ;;  %v154_v23 = vld [vmem:[%s472_s1 + $0x70] sm:$0xff] (!%p112_p2) }
   0xa   : > { %v360_v22 = vpack.c.bf16 (!%p112_p2), %v153_v21, %v152_v20  ;;  %v155_v24 = vld [vmem:[%s472_s1 + $0x78] sm:$0xff] (!%p112_p2) }
   0xb   : > { %v363_v25 = vpack.c.bf16 (!%p112_p2), %v155_v24, %v154_v23 }
   0xc   : > { %346 = vmatpush3.bf16.msra.mxu0 (!%p112_p2), %v345_v7 }
   0xd   : > { %347 = vmatprep.subr.bf16.mxu0 %v384_v3  ;;  %s475_s10 = smov (!%p131_p3, %s280_s10), 1 }
   0xe   : > { %s285_s17 = sshll.u32 %s475_s10, 3 }
   0xf   : > { %s134_s20 = scalar_lea.vmem %s471_s0, %s285_s17  ;;  %s138_s23 = scalar_lea.vmem %s473_s2, %s285_s17 }
  0x10   : > { %349 = vmatpush3.bf16.msra.mxu0 %v348_v10  ;;  %v139_v26 = vld [vmem:[%s134_s20] sm:$0xff] }
  0x11   : > { %350 = vmatprep.subr.bf16.mxu0 %v384_v3 }
  0x14   : > { %352 = vmatpush3.bf16.msra.mxu0 %v351_v13 }
  0x15   : > { %353 = vmatprep.subr.bf16.mxu0 %v384_v3 }
  0x18   : > { %355 = vmatpush3.bf16.msra.mxu0 %v354_v16 }
  0x19   : > { %356 = vmatprep.subr.bf16.mxu0 %v384_v3 }
  0x1c   : > { %358 = vmatpush3.bf16.msra.mxu0 %v357_v19 }
  0x1d   : > { %359 = vmatprep.subr.bf16.mxu0 %v384_v3 }
  0x20   : > { %361 = vmatpush3.bf16.msra.mxu0 %v360_v22 }
  0x21   : > { %362 = vmatprep.subr.bf16.mxu0 %v384_v3 }
  0x24   : > { %364 = vmatpush3.bf16.msra.mxu0 %v363_v25 }
  0x27   : > { %339 = vmatmul.mubr.f32.vlgmr.msra.gmra.mrb[0].mxu0 %v139_v26 }
  0xfa   : > { %v222_v27 = vpop.f32.mrb[0].mxu0 }
  0xfb   : > { %v223_v28 = vadd.f32 128.0, %v222_v27  ;;  %v340_v29 = vpop.f32.mrb[1].mxu0 }
  0xfd   : > { %226 = vst [vmem:[%s138_s23] sm:$0xff] %v223_v28 }
  0xfe PF: > { %s12_s9 = sadd.s32 1, %s382_s9  }
  0xff   : > { %p9_p4 = scmp.ge.s32.totalorder %s12_s9, 4  }
 0x101   :  { %11 = sbr.rel (!%p9_p4) target bundleno = 1 (0x1), region = 58 }

// kernel: decompress_jpeg.4
= control target key start
LH: loop header
LB: loop body
LE: loop exit
PB: predicated region body
PF: predicated region fallthrough
CT: control target
= control target key end

     0   :  { %s460_s9 = smov 0   ;;  %s538_s0 = inlined_call_operand.vmem [shape: f32[64,128], index: 0, kind: input, shape index: {}]   ;;  %s539_s1 = inlined_call_operand.vmem [shape: f32[128,128], index: 1, kind: input, shape index: {}]   ;;  %s540_s2 = inlined_call_operand.vmem [shape: f32[64,128], index: 2, kind: output, shape index: {}]  }
   0x1 LB: > { %s312_s10 = sadd.s32 4294967295, %s443_s9   ;;  %p316_p0 = scmp.ge.s32.totalorder %s443_s9, 1  ;;  %s443_s9 = sphi %s460_s9, %s12_s9  }
   0x2   : > { %p113_p1 = scmp.lt.s32.totalorder %s443_s9, 3 }
   0x4   : > { %p114_p2 = pnand %p316_p0, %p113_p1 }
   0x5   : > { %v151_v0 = vld [vmem:[%s539_s1] sm:$0xff] (!%p114_p2)  ;;  %v152_v1 = vld [vmem:[%s539_s1 + $0x8] sm:$0xff] (!%p114_p2)  ;;  %v153_v2 = vld [vmem:[%s539_s1 + $0x10] sm:$0xff] (!%p114_p2)  ;;  %s317_s17 = sshll.u32 (!%p114_p2), %s312_s10, 2 }
   0x6   : > { %117 = sbr.rel (%p114_p2) target bundleno = 257 (0x101), region = 28  ;;  %v381_v3 = vpack.c.bf16 (!%p114_p2), %v152_v1, %v151_v0  ;;  %v154_v4 = vld [vmem:[%s539_s1 + $0x18] sm:$0xff] (!%p114_p2)  ;;  %p136_p3 = scmp.lt.s32.totalorder (!%p114_p2), %s317_s17, 7  ;;  %v155_v6 = vld [vmem:[%s539_s1 + $0x20] sm:$0xff] (!%p114_p2)  ;;  %v156_v7 = vld [vmem:[%s539_s1 + $0x28] sm:$0xff] (!%p114_p2) }
   0x7   : > { %v385_v5 = vpack.c.bf16 (!%p114_p2), %v154_v4, %v153_v2  ;;  %v389_v8 = vpack.c.bf16 (!%p114_p2), %v156_v7, %v155_v6  ;;  %v157_v9 = vld [vmem:[%s539_s1 + $0x30] sm:$0xff] (!%p114_p2)  ;;  %v158_v10 = vld [vmem:[%s539_s1 + $0x38] sm:$0xff] (!%p114_p2)  ;;  %v159_v14 = vld [vmem:[%s539_s1 + $0x40] sm:$0xff] (!%p114_p2) }
   0x8   : > { %382 = vmatprep.subr.bf16.mxu0 (!%p114_p2), %v381_v3  ;;  %413 = vmatprep.subr.bf16.mxu1 (!%p114_p2), %v381_v3  ;;  %v393_v13 = vpack.c.bf16 (!%p114_p2), %v158_v10, %v157_v9  ;;  %v160_v15 = vld [vmem:[%s539_s1 + $0x48] sm:$0xff] (!%p114_p2)  ;;  %v161_v17 = vld [vmem:[%s539_s1 + $0x50] sm:$0xff] (!%p114_p2)  ;;  %v162_v18 = vld [vmem:[%s539_s1 + $0x58] sm:$0xff] (!%p114_p2) }
   0x9   : > { %384 = vmatpush3.bf16.msra.mxu0 (!%p114_p2), %v381_v3  ;;  %421 = vmatpush3.bf16.msra.mxu1 (!%p114_p2), %v381_v3  ;;  %v397_v16 = vpack.c.bf16 (!%p114_p2), %v160_v15, %v159_v14  ;;  %v401_v19 = vpack.c.bf16 (!%p114_p2), %v162_v18, %v161_v17  ;;  %v163_v20 = vld [vmem:[%s539_s1 + $0x60] sm:$0xff] (!%p114_p2)  ;;  %v164_v21 = vld [vmem:[%s539_s1 + $0x68] sm:$0xff] (!%p114_p2)  ;;  %v165_v23 = vld [vmem:[%s539_s1 + $0x70] sm:$0xff] (!%p114_p2) }
   0xa   : > { %386 = vmatprep.subr.bf16.mxu0 (!%p114_p2), %v385_v5  ;;  %414 = vmatprep.subr.bf16.mxu1 (!%p114_p2), %v385_v5  ;;  %v405_v22 = vpack.c.bf16 (!%p114_p2), %v164_v21, %v163_v20  ;;  %v166_v24 = vld [vmem:[%s539_s1 + $0x78] sm:$0xff] (!%p114_p2) }
   0xb   : > { %v409_v25 = vpack.c.bf16 (!%p114_p2), %v166_v24, %v165_v23 }
   0xd   : > { %s542_s17 = smov (!%p136_p3, %s317_s17), 7  ;;  %388 = vmatpush3.bf16.msra.mxu0 %v385_v5  ;;  %422 = vmatpush3.bf16.msra.mxu1 %v385_v5 }
   0xe   : > { %s318_s24 = sshll.u32 %s542_s17, 3  ;;  %390 = vmatprep.subr.bf16.mxu0 %v389_v8  ;;  %415 = vmatprep.subr.bf16.mxu1 %v389_v8 }
   0xf   : > { %s500_s3 = scalar_lea.vmem %s538_s0, %s318_s24  ;;  %s145_s25 = scalar_lea.vmem %s540_s2, %s318_s24 }
  0x10   : > { %v147_v11 = vld [vmem:[%s500_s3] sm:$0xff]  ;;  %v149_v12 = vld [vmem:[%s500_s3 + $0x10] sm:$0xff]  ;;  %v148_v26 = vld [vmem:[%s500_s3 + $0x8] sm:$0xff] }
  0x11   : > { %375 = vmatprep.mubr.f32.mxu0 %v147_v11  ;;  %378 = vmatprep.mubr.f32.mxu1 %v149_v12  ;;  %v150_v27 = vld [vmem:[%s500_s3 + $0x18] sm:$0xff] }
  0x12   : > { %392 = vmatpush3.bf16.msra.mxu0 %v389_v8  ;;  %423 = vmatpush3.bf16.msra.mxu1 %v389_v8 }
  0x13   : > { %394 = vmatprep.subr.bf16.mxu0 %v393_v13  ;;  %416 = vmatprep.subr.bf16.mxu1 %v393_v13 }
  0x16   : > { %396 = vmatpush3.bf16.msra.mxu0 %v393_v13  ;;  %424 = vmatpush3.bf16.msra.mxu1 %v393_v13 }
  0x17   : > { %398 = vmatprep.subr.bf16.mxu0 %v397_v16  ;;  %417 = vmatprep.subr.bf16.mxu1 %v397_v16 }
  0x1a   : > { %400 = vmatpush3.bf16.msra.mxu0 %v397_v16  ;;  %425 = vmatpush3.bf16.msra.mxu1 %v397_v16 }
  0x1b   : > { %402 = vmatprep.subr.bf16.mxu0 %v401_v19  ;;  %418 = vmatprep.subr.bf16.mxu1 %v401_v19 }
  0x1e   : > { %404 = vmatpush3.bf16.msra.mxu0 %v401_v19  ;;  %426 = vmatpush3.bf16.msra.mxu1 %v401_v19 }
  0x1f   : > { %406 = vmatprep.subr.bf16.mxu0 %v405_v22  ;;  %419 = vmatprep.subr.bf16.mxu1 %v405_v22 }
  0x22   : > { %408 = vmatpush3.bf16.msra.mxu0 %v405_v22  ;;  %427 = vmatpush3.bf16.msra.mxu1 %v405_v22 }
  0x23   : > { %410 = vmatprep.subr.bf16.mxu0 %v409_v25  ;;  %420 = vmatprep.subr.bf16.mxu1 %v409_v25 }
  0x26   : > { %412 = vmatpush3.bf16.msra.mxu0 %v409_v25  ;;  %428 = vmatpush3.bf16.msra.mxu1 %v409_v25 }
  0x29   : > { %376 = vmatmul.mubr.f32.vlgmr.msra.gmra.mrb[0].mxu0 %v148_v26  ;;  %379 = vmatmul.mubr.f32.vlgmr.msra.gmra.mrb[0].mxu1 %v150_v27 }
  0xfc   : > { %v377_v28 = vpop.f32.mrb[0].mxu0  ;;  %v380_v29 = vpop.f32.mrb[0].mxu1 }
  0xfd   : > { %v233_v30 = vpop.f32.mrb[1].mxu0  ;;  %v243_v31 = vpop.f32.mrb[1].mxu1  ;;  %v239_v34 = vadd.f32 128.0, %v377_v28  ;;  %v249_v35 = vadd.f32 128.0, %v380_v29 }
  0xfe   : > { %v234_v32 = vadd.f32 128.0, %v233_v30  ;;  %v244_v33 = vadd.f32 128.0, %v243_v31 }
  0xff   : > { %253 = vst [vmem:[%s145_s25 + $0x8] sm:$0xff] %v239_v34  ;;  %255 = vst [vmem:[%s145_s25 + $0x18] sm:$0xff] %v249_v35 }
 0x100   : > { %252 = vst [vmem:[%s145_s25] sm:$0xff] %v234_v32  ;;  %254 = vst [vmem:[%s145_s25 + $0x10] sm:$0xff] %v244_v33 }
 0x101 PF: > { %s12_s9 = sadd.s32 1, %s443_s9  }
 0x102   : > { %p9_p4 = scmp.ge.s32.totalorder %s12_s9, 4  }
 0x104   :  { %11 = sbr.rel (!%p9_p4) target bundleno = 1 (0x1), region = 58 }

// kernel: decompress_jpeg.7
= control target key start
LH: loop header
LB: loop body
LE: loop exit
PB: predicated region body
PF: predicated region fallthrough
CT: control target
= control target key end

     0   :  { %8 = vsyncpa [#allocation3], 0  ;;  %s1078_s0 = inlined_call_operand.vmem [shape: f32[2,64,64], index: 0, kind: input, shape index: {}]   ;;  %s1079_s1 = inlined_call_operand.vmem [shape: f32[2,64,64], index: 1, kind: input, shape index: {}]   ;;  %s1080_s2 = inlined_call_operand.vmem [shape: f32[2,64,64], index: 2, kind: input, shape index: {}]   ;;  %s1081_s3 = inlined_call_operand.hbm [shape: f32[2,3,64,64], index: 3, kind: output, shape index: {}]  }
   0x1   :  { %10 = vsyncpa [#allocation3 + $0x1], 0  ;;  %s793_s12 = smov 0   ;;  %s795_s13 = smov 0  }
   0x2   :  { %s797_s14 = smov 0   ;;  %s799_s15 = smov 0  }
   0x3   :  { %s801_s16 = smov 0   ;;  %s803_s17 = smov 0  }
   0x4 LB: > { %s582_s18 = sadd.s32 4294967295, %s768_s17   ;;  %s583_s19 = sadd.s32 4294967294, %s768_s17   ;;  %s768_s17 = sphi %s803_s17, %s16_s17   ;;  %s764_s16 = sphi %s801_s16, %s1088_s16   ;;  %s760_s15 = sphi %s799_s15, %s1087_s15   ;;  %s756_s14 = sphi %s797_s14, %s1086_s14   ;;  %s752_s13 = sphi %s795_s13, %s1085_s13   ;;  %s748_s12 = sphi %s793_s12, %s1084_s12  }
   0x5   : > { %s28_s20 = sadd.s32 1, %s764_s16  ;;  %s121_s21 = sadd.s32 1, %s756_s14 }
   0x6   : > { %p30_p0 = scmp.ge.s32.totalorder %s28_s20, 2  ;;  %p131_p1 = scmp.ne.s32.totalorder %s756_s14, %s752_s13 }
   0x7   : > { %p132_p2 = scmp.eq.s32.totalorder %s582_s18, 1  ;;  %p137_p3 = scmp.ne.s32.totalorder %s752_s13, %s748_s12 }
   0x8   : > { %s1090_s20 = smov (%p30_p0, %s28_s20), 0  ;;  %p138_p5 = scmp.eq.s32.totalorder %s583_s19, 1 }
   0x9   : > { %p833_p4 = por %p132_p2, %p131_p1  ;;  %s116_s23 = ssub.s32 %s764_s16, %s1090_s20 }
   0xa   : > { %p586_p6 = scmp.ge.s32.totalorder %s768_s17, 1  ;;  %p119_p7 = scmp.eq.s32.totalorder %s116_s23, 0 }
   0xb   : > { %p840_p8 = por %p138_p5, %p137_p3  ;;  %p195_p9 = scmp.lt.s32.totalorder %s768_s17, 3 }
   0xc   : > { %s846_s25 = scalar_select %p119_p7, %s756_s14, %s121_s21  }
   0xd   : > { %p196_p10 = pnand %p586_p6, %p195_p9 }
   0xe   : > { %p242_p11 = scmp.lt.s32.totalorder (!%p196_p10), %s760_s15, 1  ;;  %s238_s28 = sand.u32 (!%p196_p10), 1, %s752_s13   ;;  %vm344_vm0 = vcmask (!%p196_p10), 523264  }
   0xf   : > { %199 = sbr.rel (%p196_p10) target bundleno = 81 (0x51), region = 32  ;;  %s770_s30 = smov (!%p196_p10), [#allocation2]  }
  0x10   : > { %s868_s8 = smul.u32 (!%p196_p10), 192, %s238_s28 }
  0x11   : > { %s632_s19 = smul.u32 (!%p196_p10), 3072, %s760_s15 }
  0x12   : > { %s935_s18 = scalar_lea.vmem (!%p196_p10), [#allocation2], %s868_s8 }
  0x13   : > { %s467_s21 = sshll.u32 (!%p196_p10), %s935_s18, 4  ;;  %s1024_s21 = int_to_ptr.vmem [resolvable:$true] %s467_s21 }
  0x14   : > { %s690_s29 = scalar_lea.vmem (!%p196_p10), %s1024_s21, 3072 }
  0x15   : > { %p691_p12 = scmp.ne.s32.totalorder (!%p196_p10), %s1024_s21, %s690_s29 }
  0x16   : > { %s243_s26 = scalar_select %p242_p11, %s760_s15, 1 }
  0x17   : > { %p692_p13 = pnand %p691_p12, %p833_p4 }
  0x18   : > { %s628_s27 = sshll.u32 %s243_s26, 6  ;;  %s1022_s26 = scalar_lea.hbm %s1081_s3, %s632_s19 }
  0x19   : > { %s854_s4 = scalar_lea.vmem %s1080_s2, %s628_s27  ;;  %s859_s7 = scalar_lea.vmem %s1078_s0, %s628_s27 }
  0x1a   : > { %v296_v0 = vld [vmem:[%s854_s4] sm:$0xff]  ;;  %v297_v2 = vld [vmem:[%s854_s4 + $0x8] sm:$0xff]  ;;  %v298_v3 = vld [vmem:[%s854_s4 + $0x10] sm:$0xff]  ;;  %s901_s11 = scalar_lea.vmem %s1079_s1, %s628_s27  ;;  %s1032_s27 = scalar_lea.sflag [#allocation3], %s238_s28 }
  0x1b   : > { %v862_v1 = vadd.f32 -128.0, %v296_v0  ;;  %v870_v4 = vadd.f32 -128.0, %v297_v2  ;;  %v872_v5 = vadd.f32 -128.0, %v298_v3  ;;  %v299_v6 = vld [vmem:[%s854_s4 + $0x18] sm:$0xff]  ;;  %v876_v7 = vld [vmem:[%s859_s7] sm:$0xff]  ;;  %v301_v11 = vld [vmem:[%s854_s4 + $0x28] sm:$0xff]  ;;  %p693_p0 = pneg %p692_p13 }
  0x1c   : > { %v879_v9 = vadd.f32 -128.0, %v299_v6  ;;  %v300_v10 = vld [vmem:[%s854_s4 + $0x20] sm:$0xff]  ;;  %v887_v15 = vadd.f32 -128.0, %v301_v11  ;;  %v891_v17 = vld [vmem:[%s859_s7 + $0x8] sm:$0xff]  ;;  %v894_v18 = vld [vmem:[%s859_s7 + $0x10] sm:$0xff] }
  0x1d   : > { %v312_v8 = vmul.f32 1.402, %v862_v1  ;;  %v313_v12 = vmul.f32 1.402, %v870_v4  ;;  %v314_v13 = vmul.f32 1.402, %v872_v5 }
  0x1e   : > { %v885_v14 = vadd.f32 -128.0, %v300_v10  ;;  %v315_v19 = vmul.f32 1.402, %v879_v9  ;;  %v302_v20 = vld [vmem:[%s854_s4 + $0x30] sm:$0xff]  ;;  %v906_v23 = vld [vmem:[%s859_s7 + $0x18] sm:$0xff]  ;;  %v913_v29 = vld [vmem:[%s859_s7 + $0x20] sm:$0xff] }
  0x1f   : > { %v320_v16 = vadd.f32 %v312_v8, %v876_v7  ;;  %v321_v21 = vadd.f32 %v313_v12, %v891_v17  ;;  %v322_v22 = vadd.f32 %v314_v13, %v894_v18  ;;  %v317_v25 = vmul.f32 1.402, %v887_v15  ;;  %v303_v26 = vld [vmem:[%s854_s4 + $0x38] sm:$0xff]  ;;  %v916_v30 = vld [vmem:[%s859_s7 + $0x28] sm:$0xff]  ;;  %v280_v37 = vld [vmem:[%s901_s11] sm:$0xff]  ;;  %s694_s4 = sshll.u32 %s770_s30, 4  ;;  %s695_s4 = int_to_ptr.vmem [resolvable:$false] %s694_s4 }
  0x20   : > { %v316_v24 = vmul.f32 1.402, %v885_v14  ;;  %v323_v28 = vadd.f32 %v315_v19, %v906_v23  ;;  %v918_v31 = vadd.f32 -128.0, %v302_v20  ;;  %v920_v32 = vadd.f32 -128.0, %v303_v26  ;;  %v281_v38 = vld [vmem:[%s901_s11 + $0x8] sm:$0xff]  ;;  %v929_v47 = vld [vmem:[%s859_s7 + $0x30] sm:$0xff]  ;;  %p697_p1 = scmp.lt.s32.totalorder %s1024_s21, %s695_s4 }
  0x21   : > { %v328_v27 = vmax.f32 %v320_v16, 0.0  ;;  %v329_v33 = vmax.f32 %v321_v21, 0.0  ;;  %v330_v34 = vmax.f32 %v322_v22, 0.0  ;;  %v325_v36 = vadd.f32 %v317_v25, %v916_v30  ;;  %v932_v48 = vld [vmem:[%s859_s7 + $0x38] sm:$0xff]  ;;  %v282_v53 = vld [vmem:[%s901_s11 + $0x10] sm:$0xff]  ;;  %v284_v55 = vld [vmem:[%s901_s11 + $0x20] sm:$0xff] }
  0x22   : > { %v324_v35 = vadd.f32 %v316_v24, %v913_v29  ;;  %v331_v40 = vmax.f32 %v323_v28, 0.0  ;;  %v318_v41 = vmul.f32 1.402, %v918_v31  ;;  %v319_v42 = vmul.f32 1.402, %v920_v32  ;;  %v283_v54 = vld [vmem:[%s901_s11 + $0x18] sm:$0xff] }
  0x23   : > { %v336_v39 = vmin.f32 %v328_v27, 255.0  ;;  %v337_v43 = vmin.f32 %v329_v33, 255.0  ;;  %v338_v44 = vmin.f32 %v330_v34, 255.0  ;;  %v333_v46 = vmax.f32 %v325_v36, 0.0  ;;  %v285_v60 = vld [vmem:[%s901_s11 + $0x28] sm:$0xff]  ;;  %v286_v20 = vld [vmem:[%s901_s11 + $0x30] sm:$0xff] }
  0x24   : > { %v332_v45 = vmax.f32 %v324_v35, 0.0  ;;  %v339_v49 = vmin.f32 %v331_v40, 255.0  ;;  %v326_v50 = vadd.f32 %v318_v41, %v929_v47  ;;  %v327_v51 = vadd.f32 %v319_v42, %v932_v48  ;;  %v287_v28 = vld [vmem:[%s901_s11 + $0x38] sm:$0xff]  ;;  %s696_s5 = scalar_lea.vmem %s695_s4, 6144 }
  0x25   : > { %345 = vst.msk [vmem:[%s935_s18] sm:$0xff] %vm344_vm0, %v336_v39  ;;  %v941_v52 = vadd.f32 -128.0, %v280_v37  ;;  %346 = vst.msk [vmem:[%s935_s18 + $0x8] sm:$0xff] %vm344_vm0, %v337_v43  ;;  %v341_v57 = vmin.f32 %v333_v46, 255.0  ;;  %v369_v58 = vmul.f32 0.714136, %v862_v1  ;;  %p698_p2 = scmp.lt.s32.totalorder %s696_s5, %s690_s29 }
  0x26   : > { %347 = vst.msk [vmem:[%s935_s18 + $0x10] sm:$0xff] %vm344_vm0, %v338_v44  ;;  %v340_v56 = vmin.f32 %v332_v45, 255.0  ;;  %v594_v59 = vadd.f32 -128.0, %v281_v38  ;;  %348 = vst.msk [vmem:[%s935_s18 + $0x18] sm:$0xff] %vm344_vm0, %v339_v49  ;;  %v334_v61 = vmax.f32 %v326_v50, 0.0  ;;  %v335_v62 = vmax.f32 %v327_v51, 0.0 }
  0x27   : > { %v353_v63 = vmul.f32 0.344136, %v941_v52  ;;  %v370_v0 = vmul.f32 0.714136, %v870_v4  ;;  %350 = vst.msk [vmem:[%s935_s18 + $0x28] sm:$0xff] %vm344_vm0, %v341_v57  ;;  %v595_v3 = vadd.f32 -128.0, %v282_v53  ;;  %p699_p3 = por %p698_p2, %p697_p1 }
  0x28   : > { %349 = vst.msk [vmem:[%s935_s18 + $0x20] sm:$0xff] %vm344_vm0, %v340_v56  ;;  %v354_v2 = vmul.f32 0.344136, %v594_v59  ;;  %v371_v1 = vmul.f32 0.714136, %v872_v5  ;;  %v596_v6 = vadd.f32 -128.0, %v283_v54 }
  0x29   : > { %v342_v8 = vmin.f32 %v334_v61, 255.0  ;;  %v343_v10 = vmin.f32 %v335_v62, 255.0  ;;  %v361_v11 = vsub.f32 %v876_v7, %v353_v63  ;;  %v372_v12 = vmul.f32 0.714136, %v879_v9  ;;  %p700_p5 = pnand %p699_p3, %p693_p0 }
  0x2a   : > { %v362_v4 = vsub.f32 %v891_v17, %v354_v2  ;;  %v355_v13 = vmul.f32 0.344136, %v595_v3  ;;  %v356_v16 = vmul.f32 0.344136, %v596_v6  ;;  %v597_v19 = vadd.f32 -128.0, %v284_v55 }
  0x2b   : > { %351 = vst.msk [vmem:[%s935_s18 + $0x30] sm:$0xff] %vm344_vm0, %v342_v8  ;;  %352 = vst.msk [vmem:[%s935_s18 + $0x38] sm:$0xff] %vm344_vm0, %v343_v10  ;;  %v377_v21 = vsub.f32 %v361_v11, %v369_v58  ;;  %v373_v5 = vmul.f32 0.714136, %v885_v14  ;;  %v598_v22 = vadd.f32 -128.0, %v285_v60  ;;  %v599_v35 = vadd.f32 -128.0, %v286_v20 }
  0x2c   : > { %v374_v24 = vmul.f32 0.714136, %v887_v15  ;;  %v378_v25 = vsub.f32 %v362_v4, %v370_v0  ;;  %v363_v9 = vsub.f32 %v894_v18, %v355_v13  ;;  %v364_v26 = vsub.f32 %v906_v23, %v356_v16 }
  0x2d   : > { %v357_v27 = vmul.f32 0.344136, %v597_v19  ;;  %v385_v33 = vmax.f32 %v377_v21, 0.0  ;;  %v358_v34 = vmul.f32 0.344136, %v598_v22  ;;  %v600_v42 = vadd.f32 -128.0, %v287_v28 }
  0x2e   : > { %v375_v36 = vmul.f32 0.714136, %v918_v31  ;;  %v386_v37 = vmax.f32 %v378_v25, 0.0  ;;  %v379_v38 = vsub.f32 %v363_v9, %v371_v1  ;;  %v380_v14 = vsub.f32 %v364_v26, %v372_v12 }
  0x2f   : > { %v365_v39 = vsub.f32 %v913_v29, %v357_v27  ;;  %v393_v15 = vmin.f32 %v385_v33, 255.0  ;;  %v366_v40 = vsub.f32 %v916_v30, %v358_v34  ;;  %v359_v41 = vmul.f32 0.344136, %v599_v35 }
  0x30   : > { %v394_v43 = vmin.f32 %v386_v37, 255.0  ;;  %v387_v44 = vmax.f32 %v379_v38, 0.0  ;;  %v388_v45 = vmax.f32 %v380_v14, 0.0  ;;  %v360_v50 = vmul.f32 0.344136, %v600_v42 }
  0x31   : > { %v381_v46 = vsub.f32 %v365_v39, %v373_v5  ;;  %609 = vst.msk [vmem:[%s935_s18 + $0x40] sm:$0xff] %vm344_vm0, %v393_v15  ;;  %v382_v31 = vsub.f32 %v366_v40, %v374_v24  ;;  %v367_v49 = vsub.f32 %v929_v47, %v359_v41  ;;  %v376_v51 = vmul.f32 0.714136, %v920_v32 }
  0x32   : > { %610 = vst.msk [vmem:[%s935_s18 + $0x48] sm:$0xff] %vm344_vm0, %v394_v43  ;;  %v395_v53 = vmin.f32 %v387_v44, 255.0  ;;  %v396_v54 = vmin.f32 %v388_v45, 255.0  ;;  %v410_v56 = vmul.f32 1.772, %v941_v52  ;;  %v368_v60 = vsub.f32 %v932_v48, %v360_v50 }
  0x33   : > { %v389_v55 = vmax.f32 %v381_v46, 0.0  ;;  %v390_v57 = vmax.f32 %v382_v31, 0.0  ;;  %v383_v58 = vsub.f32 %v367_v49, %v375_v36  ;;  %v411_v61 = vmul.f32 1.772, %v594_v59 }
  0x34   : > { %611 = vst.msk [vmem:[%s935_s18 + $0x50] sm:$0xff] %vm344_vm0, %v395_v53  ;;  %612 = vst.msk [vmem:[%s935_s18 + $0x58] sm:$0xff] %vm344_vm0, %v396_v54  ;;  %v418_v32 = vadd.f32 %v410_v56, %v876_v7  ;;  %v412_v63 = vmul.f32 1.772, %v595_v3  ;;  %v413_v0 = vmul.f32 1.772, %v596_v6  ;;  %v384_v8 = vsub.f32 %v368_v60, %v376_v51 }
  0x35   : > { %v397_v62 = vmin.f32 %v389_v55, 255.0  ;;  %v398_v2 = vmin.f32 %v390_v57, 255.0  ;;  %v391_v1 = vmax.f32 %v383_v58, 0.0  ;;  %v419_v52 = vadd.f32 %v411_v61, %v891_v17 }
  0x36   : > { %v426_v10 = vmax.f32 %v418_v32, 0.0  ;;  %v420_v59 = vadd.f32 %v412_v63, %v894_v18  ;;  %v421_v11 = vadd.f32 %v413_v0, %v906_v23  ;;  %v414_v12 = vmul.f32 1.772, %v597_v19 }
  0x37   : > { %613 = vst.msk [vmem:[%s935_s18 + $0x60] sm:$0xff] %vm344_vm0, %v397_v62  ;;  %614 = vst.msk [vmem:[%s935_s18 + $0x68] sm:$0xff] %vm344_vm0, %v398_v2  ;;  %v399_v7 = vmin.f32 %v391_v1, 255.0  ;;  %v392_v3 = vmax.f32 %v384_v8, 0.0  ;;  %v427_v6 = vmax.f32 %v419_v52, 0.0 }
  0x38   : > { %v415_v4 = vmul.f32 1.772, %v598_v22  ;;  %v434_v13 = vmin.f32 %v426_v10, 255.0  ;;  %v428_v16 = vmax.f32 %v420_v59, 0.0  ;;  %v429_v17 = vmax.f32 %v421_v11, 0.0 }
  0x39   : > { %v422_v20 = vadd.f32 %v414_v12, %v913_v29  ;;  %615 = vst.msk [vmem:[%s935_s18 + $0x70] sm:$0xff] %vm344_vm0, %v399_v7  ;;  %v400_v18 = vmin.f32 %v392_v3, 255.0  ;;  %v435_v23 = vmin.f32 %v427_v6, 255.0  ;;  %v416_v21 = vmul.f32 1.772, %v599_v35 }
  0x3a   : > { %v423_v19 = vadd.f32 %v415_v4, %v916_v30  ;;  %617 = vst.msk [vmem:[%s935_s18 + $0x80] sm:$0xff] %vm344_vm0, %v434_v13  ;;  %v436_v5 = vmin.f32 %v428_v16, 255.0  ;;  %v437_v22 = vmin.f32 %v429_v17, 255.0  ;;  %v417_v25 = vmul.f32 1.772, %v600_v42 }
  0x3b   : > { %v430_v24 = vmax.f32 %v422_v20, 0.0  ;;  %616 = vst.msk [vmem:[%s935_s18 + $0x78] sm:$0xff] %vm344_vm0, %v400_v18  ;;  %618 = vst.msk [vmem:[%s935_s18 + $0x88] sm:$0xff] %vm344_vm0, %v435_v23  ;;  %v424_v9 = vadd.f32 %v416_v21, %v929_v47 }
  0x3c   : > { %v431_v29 = vmax.f32 %v423_v19, 0.0  ;;  %619 = vst.msk [vmem:[%s935_s18 + $0x90] sm:$0xff] %vm344_vm0, %v436_v5  ;;  %620 = vst.msk [vmem:[%s935_s18 + $0x98] sm:$0xff] %vm344_vm0, %v437_v22  ;;  %v425_v26 = vadd.f32 %v417_v25, %v932_v48 }
  0x3d   : > { %v438_v30 = vmin.f32 %v430_v24, 255.0  ;;  %v432_v28 = vmax.f32 %v424_v9, 0.0 }
  0x3e   : > { %v439_v27 = vmin.f32 %v431_v29, 255.0  ;;  %v433_v33 = vmax.f32 %v425_v26, 0.0 }
  0x3f   : > { %621 = vst.msk [vmem:[%s935_s18 + $0xa0] sm:$0xff] %vm344_vm0, %v438_v30  ;;  %v440_v47 = vmin.f32 %v432_v28, 255.0 }
  0x40   : > { %622 = vst.msk [vmem:[%s935_s18 + $0xa8] sm:$0xff] %vm344_vm0, %v439_v27  ;;  %v441_v48 = vmin.f32 %v433_v33, 255.0 }
  0x41   : > { %623 = vst.msk [vmem:[%s935_s18 + $0xb0] sm:$0xff] %vm344_vm0, %v440_v47 }
  0x42   : > { %624 = vst.msk [vmem:[%s935_s18 + $0xb8] sm:$0xff] %vm344_vm0, %v441_v48 }
  0x43   : > { %703 = shalt.err (!%p700_p5)
}
  0x44   : > { %s704_s28 = scalar_lea.hbm %s1022_s26, 3072  ;;  %s708_s8 = scalar_lea.hbm %s1081_s3, 6144 }
  0x45   : > { %p705_p6 = scmp.ne.s32.totalorder %s1022_s26, %s704_s28  ;;  %p709_p10 = scmp.lt.u32.totalorder %s1022_s26, %s1081_s3 }
  0x46   : > { %p710_p11 = scmp.lt.u32.totalorder %s708_s8, %s704_s28  ;;  %p712_p13 = scmp.lt.u32.totalorder %s704_s28, %s1022_s26 }
  0x47   : > { %p706_p7 = pnand %p705_p6, %p833_p4 }
  0x48   : > { %p711_p12 = por %p710_p11, %p709_p10 }
  0x49   : > { %p707_p9 = pneg %p706_p7 }
  0x4a   : > { %p713_p0 = por %p712_p13, %p711_p12 }
  0x4c   : > { %p714_p1 = pnand %p713_p0, %p707_p9 }
  0x4e   : > { %717 = shalt.err (!%p714_p1)
}
  0x4f   : > { %s771_s11 = smov 128   ;;  %s772_s18 = smov 8  }
  0x50   : > { %633 = dma.vmem_to_hbm [thread:$0]  (%p833_p4), %s1024_s21, 3072, %s1022_s26, %s1032_s27, %s771_s11, %s771_s11, %s772_s18  }
  0x51 PF: > { %p639_p2 = scmp.ge.s32.totalorder %s768_s17, 2  ;;  %s482_s19 = sand.u32 1, %s748_s12  }
  0x52   : > { %s483_s15 = scalar_lea.sflag [#allocation3], %s482_s19 }
  0x53   : > { %p636_p3 = pnand %p639_p2, %p840_p8 }
  0x55   : > { %743 = dma.done.wait (!%p636_p3), %s483_s15, 3072  }
  0x56   : > { %745 = vsyncadd (!%p636_p3), %s483_s15, 4294964224  ;;  %s16_s17 = sadd.s32 1, %s768_s17   ;;  %s1084_s12 = smov %s752_s13 }
  0x57   : > { %p13_p5 = scmp.ge.s32.totalorder %s16_s17, 4   ;;  %s1085_s13 = smov %s756_s14 }
  0x58   : > { %s1086_s14 = smov %s846_s25  ;;  %s1087_s15 = smov %s764_s16 }
  0x59   : > { %s1088_s16 = smov %s1090_s20  ;;  %15 = sbr.rel (!%p13_p5) target bundleno = 4 (0x4), region = 75 }
  0x60   :  { %488 = vsyncpa [#allocation3], 1 }
  0x61   :  { %490 = vsyncpa [#allocation3 + $0x1], 1 }

</bundles_post_ra>
